<compile_context>
chip_gen: v7x
topology: tpu7x:2x2x1
jax: 0.10.0
libtpu: 0.0.40
codegen_flags: <defaults>
</compile_context>

<pallas_src>
import jax
import jax.numpy as jnp
from jax import lax
from jax.experimental import pallas as pl
from jax.experimental.pallas import tpu as pltpu

SOFT_LOCAL_MAX_SIZE = 3  # => pad = 1, 3x3 window


# --------------------------------------------------------------------------- #
# Kernel                                                                      #
# --------------------------------------------------------------------------- #
def _make_soft_detection_kernel(w: int, lanes: int):
    """Kernel for row width `w` on a flattened padded spatial axis of `lanes`."""

    def kernel(masks_ref, aux_ref, x_ref, o_ref, acc_ref):
        # masks_ref: (2, L) f32  {left, right}-neighbour validity (grid-constant)
        # aux_ref:   (2, L) f32  row 0 = 1/depth_wise_max, row 1 = 1/max_per_sample
        # x_ref:     (CB, L)     one channel tile of one sample (native dtype)
        # o_ref:     (1, L)      per-sample score row (written at the last C tile)
        # acc_ref:   (1, L) f32  running max_c (e / sum_exp) * x
        c = pl.program_id(1)

        @pl.when(c == 0)
        def _init():
            acc_ref[...] = jnp.zeros_like(acc_ref)

        aux = aux_ref[...]
        inv_dmax = aux[0:1]                                    # (1, L)
        inv_mps = aux[1:2]                                     # (1, L), constant row

        # relu + exp(x / max_per_sample); the scalar reciprocal comes from the
        # pre-pass, the upcast keeps HBM in the model's native dtype.
        x = jnp.maximum(x_ref[...].astype(jnp.float32), 0.0)   # (CB, L)
        e = jnp.exp(x * inv_mps)

        # 3x3 window sum of e with 1.0-padding:
        #     sum_{3x3, pad=1.0}(e) == sum_{3x3, pad=0.0}(e - 1) + 9
        # The rows above/below each sample are physically zero-padded by the
        # wrapper (f = 0 there), so the H-direction taps need no masks; only the
        # left/right column masks remain.  All shifts are static lane rotations,
        # vectorized over the whole channel tile.
        mk = masks_ref[...]
        left_ok, right_ok = mk[0:1], mk[1:2]

        f = e - 1.0
        t = (f
             + left_ok * pltpu.roll(f, 1, axis=1)              # col j-1
             + right_ok * pltpu.roll(f, lanes - 1, axis=1))    # col j+1
        ws = (t
              + pltpu.roll(t, w, axis=1)                       # row i-1 (pad row -> 0)
              + pltpu.roll(t, lanes - w, axis=1))              # row i+1 (pad row -> 0)
        sum_exp = ws + 9.0                                     # (CB, L)

        # Channel-tile scores with 1/depth_wise_max hoisted OUT of the channel max
        # (valid: it is >= 0 and constant over channels).
        scores = (e / sum_exp) * x                             # (CB, L)
        acc_ref[...] = jnp.maximum(acc_ref[...],
                                   jnp.max(scores, axis=0, keepdims=True))

        @pl.when(c == pl.num_programs(1) - 1)
        def _finalize():
            score = acc_ref[...] * inv_dmax                    # (1, L); pad pixels stay 0
            score = score * (1.0 / jnp.sum(score))             # pads contribute 0 to the sum
            o_ref[...] = score.astype(o_ref.dtype)

    return kernel


# --------------------------------------------------------------------------- #
# Generation-aware tile / VMEM planning                                       #
# --------------------------------------------------------------------------- #
def _vmem_limit_bytes():
    cap = None
    try:
        info = pltpu.get_tpu_info()
        for name in ("vmem_capacity_bytes", "vmem_size_bytes", "vmem_bytes"):
            cap = getattr(info, name, None)
            if cap:
                break
    except Exception:
        cap = None
    if not cap:
        cap = 64 * 1024 * 1024                      # assume v7x-class (smallest VMEM)
    if cap >= 128 * 1024 * 1024:                    # v5e / v6e: 128 MiB physical
        return 100 * 1024 * 1024
    return 48 * 1024 * 1024                         # v7x: 64 MiB / TensorCore


def _pick_c_tile(C, lanes, in_bytes, vmem_limit, max_channels_per_block=None):
    """Largest channel tile whose working set fits comfortably in the VMEM budget."""
    budget = int(vmem_limit * 0.8)
    # Fixed small blocks: masks (2,L) x2 bufs + aux (2,L) x2 + out (1,L) x2 + acc (1,L).
    fixed = (2 * 2 + 2 * 2 + 2 * 1 + 1) * lanes * 4
    # Per channel row: 2 input buffers (native dtype) + ~5 live f32 temporaries
    # (x, e, t/ws, sum_exp, scores).
    per_row = lanes * (2 * in_bytes + 5 * 4)
    cb = max(1, (budget - fixed) // per_row)
    if max_channels_per_block is not None:
        cb = min(cb, max_channels_per_block)
    cb = min(cb, C)
    if cb < C:
        align = 16 if in_bytes < 4 else 8           # bf16 sublane packing alignment
        cb = max(align, (cb // align) * align)
        cb = min(cb, C)
    return int(cb)


# --------------------------------------------------------------------------- #
# Wrapper                                                                     #
# --------------------------------------------------------------------------- #
def soft_detection(x, *, max_channels_per_block=None):
    """x: (B, C, H, W) float -> (B, 1, H, W) float (matches the torch module)."""
    B, C, H, W = x.shape
    Hp = H + 2                                       # one zero row above and below
    hw_p = Hp * W
    lanes = ((hw_p + 127) // 128) * 128              # lane-aligned flattened spatial axis
    in_bytes = jnp.dtype(x.dtype).itemsize

    vmem_limit = _vmem_limit_bytes()
    CB = _pick_c_tile(C, lanes, in_bytes, vmem_limit, max_channels_per_block)
    n_cb = -(-C // CB)
    Cp = n_cb * CB

    # --- cheap XLA pre-pass: per-sample / per-pixel maxima (relu folds into max) --
    xf = x.astype(jnp.float32)
    mps = jnp.maximum(jnp.max(xf.reshape(B, -1), axis=1), 0.0)          # (B,)
    dmax = jnp.maximum(jnp.max(xf, axis=1), 0.0)                        # (B, H, W)
    # Pad dmax with 1.0 so 1/dmax stays finite on pad/tail pixels (their raw score
    # is exactly 0, so they cannot perturb the normalization sum).
    dmax = jnp.pad(dmax, ((0, 0), (1, 1), (0, 0)), constant_values=1.0)
    dmax = jnp.pad(dmax.reshape(B, hw_p), ((0, 0), (0, lanes - hw_p)),
                   constant_values=1.0)                                 # (B, L)
    aux = jnp.stack(
        [1.0 / dmax, jnp.broadcast_to((1.0 / mps)[:, None], (B, lanes))],
        axis=1)                                                         # (B, 2, L)

    # --- padded, lane-dense input layout ----------------------------------------
    # Zero rows above/below (relu -> 0 => e-1 = 0 => no up/down masks), zero tail
    # to a 128 multiple, zero channels up to a CB multiple (they never win the max).
    # TODO(synk): the pad materializes one extra copy of x in HBM; if a part turns
    # out HBM-bound, fold the pad into the producing op or fall back to the 4-mask
    # variant.
    xp = jnp.pad(x, ((0, 0), (0, Cp - C), (1, 1), (0, 0)))
    xp = jnp.pad(xp.reshape(B, Cp, hw_p), ((0, 0), (0, 0), (0, lanes - hw_p)))

    # Grid-invariant left/right neighbour validity masks (fetched once).
    col = jnp.arange(lanes, dtype=jnp.int32) % W
    masks = jnp.stack([col > 0, col < W - 1]).astype(jnp.float32)       # (2, L)

    out = pl.pallas_call(
        _make_soft_detection_kernel(W, lanes),
        out_shape=jax.ShapeDtypeStruct((B, 1, lanes), x.dtype),
        grid_spec=pltpu.PrefetchScalarGridSpec(
            num_scalar_prefetch=0,
            grid=(B, n_cb),                                   # reduction (C) axis last
            in_specs=[
                pl.BlockSpec((2, lanes), lambda b, c: (0, 0)),            # masks
                pl.BlockSpec((None, 2, lanes), lambda b, c: (b, 0, 0)),   # aux rows
                pl.BlockSpec((None, CB, lanes), lambda b, c: (b, c, 0)),  # x tile
            ],
            out_specs=pl.BlockSpec((None, 1, lanes), lambda b, c: (b, 0, 0)),
            scratch_shapes=[pltpu.VMEM((1, lanes), jnp.float32)],
        ),
        compiler_params=pltpu.CompilerParams(
            dimension_semantics=("parallel", "arbitrary"),    # b across TCs, C serial
            vmem_limit_bytes=int(vmem_limit),
        ),
    )(masks, aux, xp)

    # Drop the pad rows / lane tail (layout plumbing only).
    return out[:, :, :hw_p].reshape(B, 1, Hp, W)[:, :, 1:1 + H, :]


# --------------------------------------------------------------------------- #
# Pure-JAX reference (matches the PyTorch forward exactly)                    #
# --------------------------------------------------------------------------- #
def soft_detection_ref(x):
    b = x.shape[0]
    xr = jnp.maximum(x, 0.0)
    mps = jnp.max(xr.reshape(b, -1), axis=1).reshape(b, 1, 1, 1)
    e = jnp.exp(xr / mps)
    padded = jnp.pad(e, ((0, 0), (0, 0), (1, 1), (1, 1)), constant_values=1.0)
    sum_exp = lax.reduce_window(
        padded, 0.0, lax.add, (1, 1, 3, 3), (1, 1, 1, 1), "VALID"
    )  # == 9 * avg_pool2d(padded, 3, stride=1)
    lms = e / sum_exp
    dmax = jnp.max(xr, axis=1, keepdims=True)
    dws = xr / dmax
    score = jnp.max(lms * dws, axis=1, keepdims=True)
    return score / jnp.sum(score.reshape(b, -1), axis=1).reshape(b, 1, 1, 1)


if __name__ == "__main__":
    key0, key1 = jax.random.split(jax.random.PRNGKey(0))

    # Test 1: the spec shape (single C tile on any generation).
    B, C, H, W = 2, 4, 16, 16
    x = jax.random.uniform(key0, (B, C, H, W), dtype=jnp.float32)
    # Channel 0 partly negative to exercise the relu, while the per-pixel channel
    # max stays strictly positive (the torch module itself yields NaN via 0/0 on
    # pixels where every channel is non-positive).
    x = x.at[:, 0].add(-0.5)
    out = jax.block_until_ready(soft_detection(x))
    ref = soft_detection_ref(x)
    assert out.shape == (B, 1, H, W), out.shape
    assert jnp.allclose(out, ref, atol=1e-6, rtol=1e-5), float(
        jnp.max(jnp.abs(out - ref)))

    # Test 2: non-square spatial + forced C tiling — exercises the running-max
    # accumulator across C tiles and the zero-channel-padding path.
    B2, C2, H2, W2 = 2, 12, 12, 16
    x2 = jax.random.normal(key1, (B2, C2, H2, W2), dtype=jnp.float32) * 0.5 + 0.25
    x2 = x2.at[:, -1].set(jnp.abs(x2[:, -1]) + 0.1)   # keep per-pixel channel max > 0
    out2 = jax.block_until_ready(soft_detection(x2, max_channels_per_block=8))
    ref2 = soft_detection_ref(x2)
    assert out2.shape == (B2, 1, H2, W2), out2.shape
    assert jnp.allclose(out2, ref2, atol=1e-6, rtol=1e-5), float(
        jnp.max(jnp.abs(out2 - ref2)))

    print("KERNEL_OK")
</pallas_src>

<mosaic_0001>
module attributes {stable_mosaic.version = 11 : i64} {
  func.func @kernel(%arg0: i32, %arg1: i32, %arg2: memref<2x384xf32, #tpu.memory_space<vmem>>, %arg3: memref<1x2x384xf32, #tpu.memory_space<vmem>>, %arg4: memref<1x4x384xf32, #tpu.memory_space<vmem>>, %arg5: memref<1x1x384xf32, #tpu.memory_space<vmem>>, %arg6: memref<1x384xf32, #tpu.memory_space<vmem>>) attributes {dimension_semantics = [#tpu.dimension_semantics<parallel>, #tpu.dimension_semantics<arbitrary>], iteration_bounds = array<i64: 2, 1>, scalar_prefetch = 0 : i64, scratch_operands = 1 : i64, tpu.core_type = #tpu.core_type<tc>, window_params = [{pipeline_mode = #tpu.pipeline_mode<synchronous>, transform_indices = @transform_0, window_bounds = array<i64: 2, 384>}, {transform_indices = @transform_1, window_bounds = array<i64: 1, 2, 384>}, {transform_indices = @transform_2, window_bounds = array<i64: 1, 4, 384>}, {transform_indices = @transform_3, window_bounds = array<i64: 1, 1, 384>}]} {
    %c0_i32 = arith.constant 0 : i32
    %0 = arith.cmpi eq, %arg1, %c0_i32 : i32
    %1 = arith.extui %0 : i1 to i32
    %c0_i32_0 = arith.constant 0 : i32
    %2 = arith.cmpi ne, %1, %c0_i32_0 : i32
    scf.if %2 {
      %cst_17 = arith.constant 0.000000e+00 : f32
      %43 = vector.broadcast %cst_17 : f32 to vector<1x384xf32>
      %c0_18 = arith.constant 0 : index
      %c0_19 = arith.constant 0 : index
      %44 = vector.load %arg6[%c0_18, %c0_19] : memref<1x384xf32, #tpu.memory_space<vmem>>, vector<1x384xf32>
      tpu.vector_store %arg6[%c0_18, %c0_19], %43 {strides = array<i32>} : memref<1x384xf32, #tpu.memory_space<vmem>>, vector<1x384xf32>,
    } else {
    }
    %c0 = arith.constant 0 : index
    %c0_1 = arith.constant 0 : index
    %c0_2 = arith.constant 0 : index
    %3 = vector.load %arg3[%c0, %c0_1, %c0_2] : memref<1x2x384xf32, #tpu.memory_space<vmem>>, vector<1x2x384xf32>
    %4 = vector.shape_cast %3 : vector<1x2x384xf32> to vector<2x384xf32>
    %5 = vector.extract_strided_slice %4 {offsets = [0, 0], sizes = [1, 384], strides = [1, 1]} : vector<2x384xf32> to vector<1x384xf32>
    %6 = vector.extract_strided_slice %4 {offsets = [1, 0], sizes = [1, 384], strides = [1, 1]} : vector<2x384xf32> to vector<1x384xf32>
    %c0_3 = arith.constant 0 : index
    %c0_4 = arith.constant 0 : index
    %c0_5 = arith.constant 0 : index
    %7 = vector.load %arg4[%c0_3, %c0_4, %c0_5] : memref<1x4x384xf32, #tpu.memory_space<vmem>>, vector<1x4x384xf32>
    %8 = vector.shape_cast %7 : vector<1x4x384xf32> to vector<4x384xf32>
    %cst = arith.constant 0.000000e+00 : f32
    %9 = vector.broadcast %cst : f32 to vector<4x384xf32>
    %10 = arith.maximumf %8, %9 : vector<4x384xf32>
    %11 = vector.broadcast %6 : vector<1x384xf32> to vector<4x384xf32>
    %12 = arith.mulf %10, %11 : vector<4x384xf32>
    %13 = math.exp %12 : vector<4x384xf32>
    %c0_6 = arith.constant 0 : index
    %c0_7 = arith.constant 0 : index
    %14 = vector.load %arg2[%c0_6, %c0_7] : memref<2x384xf32, #tpu.memory_space<vmem>>, vector<2x384xf32>
    %15 = vector.extract_strided_slice %14 {offsets = [0, 0], sizes = [1, 384], strides = [1, 1]} : vector<2x384xf32> to vector<1x384xf32>
    %16 = vector.extract_strided_slice %14 {offsets = [1, 0], sizes = [1, 384], strides = [1, 1]} : vector<2x384xf32> to vector<1x384xf32>
    %cst_8 = arith.constant 1.000000e+00 : f32
    %17 = vector.broadcast %cst_8 : f32 to vector<4x384xf32>
    %18 = arith.subf %13, %17 : vector<4x384xf32>
    %c1_i32 = arith.constant 1 : i32
    %19 = tpu.dynamic_rotate %18 by %c1_i32 dim 1 : vector<4x384xf32>, i32 -> vector<4x384xf32>
    %20 = vector.broadcast %15 : vector<1x384xf32> to vector<4x384xf32>
    %21 = arith.mulf %20, %19 : vector<4x384xf32>
    %22 = arith.addf %18, %21 : vector<4x384xf32>
    %c383_i32 = arith.constant 383 : i32
    %23 = tpu.dynamic_rotate %18 by %c383_i32 dim 1 : vector<4x384xf32>, i32 -> vector<4x384xf32>
    %24 = vector.broadcast %16 : vector<1x384xf32> to vector<4x384xf32>
    %25 = arith.mulf %24, %23 : vector<4x384xf32>
    %26 = arith.addf %22, %25 : vector<4x384xf32>
    %c16_i32 = arith.constant 16 : i32
    %27 = tpu.dynamic_rotate %26 by %c16_i32 dim 1 : vector<4x384xf32>, i32 -> vector<4x384xf32>
    %28 = arith.addf %26, %27 : vector<4x384xf32>
    %c368_i32 = arith.constant 368 : i32
    %29 = tpu.dynamic_rotate %26 by %c368_i32 dim 1 : vector<4x384xf32>, i32 -> vector<4x384xf32>
    %30 = arith.addf %28, %29 : vector<4x384xf32>
    %cst_9 = arith.constant 9.000000e+00 : f32
    %31 = vector.broadcast %cst_9 : f32 to vector<4x384xf32>
    %32 = arith.addf %30, %31 : vector<4x384xf32>
    %33 = arith.divf %13, %32 : vector<4x384xf32>
    %34 = arith.mulf %33, %10 : vector<4x384xf32>
    %c0_10 = arith.constant 0 : index
    %c0_11 = arith.constant 0 : index
    %35 = vector.load %arg6[%c0_10, %c0_11] : memref<1x384xf32, #tpu.memory_space<vmem>>, vector<1x384xf32>
    %cst_12 = arith.constant dense<0xFF800000> : vector<384xf32>
    %36 = vector.multi_reduction <maximumf>, %34, %cst_12 [0] : vector<4x384xf32> to vector<384xf32>
    %37 = vector.shape_cast %36 : vector<384xf32> to vector<1x384xf32>
    %38 = arith.maximumf %35, %37 : vector<1x384xf32>
    %c0_13 = arith.constant 0 : index
    %c0_14 = arith.constant 0 : index
    %39 = vector.load %arg6[%c0_13, %c0_14] : memref<1x384xf32, #tpu.memory_space<vmem>>, vector<1x384xf32>
    tpu.vector_store %arg6[%c0_13, %c0_14], %38 {strides = array<i32>} : memref<1x384xf32, #tpu.memory_space<vmem>>, vector<1x384xf32>,
    %c0_i32_15 = arith.constant 0 : i32
    %40 = arith.cmpi eq, %arg1, %c0_i32_15 : i32
    %41 = arith.extui %40 : i1 to i32
    %c0_i32_16 = arith.constant 0 : i32
    %42 = arith.cmpi ne, %41, %c0_i32_16 : i32
    scf.if %42 {
      %c0_17 = arith.constant 0 : index
      %c0_18 = arith.constant 0 : index
      %43 = vector.load %arg6[%c0_17, %c0_18] : memref<1x384xf32, #tpu.memory_space<vmem>>, vector<1x384xf32>
      %44 = arith.mulf %43, %5 : vector<1x384xf32>
      %45 = vector.shape_cast %44 : vector<1x384xf32> to vector<1x1x384xf32>
      %cst_19 = arith.constant dense<0.000000e+00> : vector<1xf32>
      %46 = vector.multi_reduction <add>, %45, %cst_19 [1, 2] : vector<1x1x384xf32> to vector<1xf32>
      %47 = vector.shape_cast %46 : vector<1xf32> to vector<1x1x1xf32>
      %48 = vector.extract %47[0, 0, 0] : f32 from vector<1x1x1xf32>
      %cst_20 = arith.constant 1.000000e+00 : f32
      %49 = arith.divf %cst_20, %48 : f32
      %50 = vector.broadcast %49 : f32 to vector<1x384xf32>
      %51 = arith.mulf %44, %50 : vector<1x384xf32>
      %c0_21 = arith.constant 0 : index
      %c0_22 = arith.constant 0 : index
      %c0_23 = arith.constant 0 : index
      %52 = vector.load %arg5[%c0_21, %c0_22, %c0_23] : memref<1x1x384xf32, #tpu.memory_space<vmem>>, vector<1x1x384xf32>
      %53 = vector.shape_cast %52 : vector<1x1x384xf32> to vector<1x384xf32>
      %54 = vector.shape_cast %51 : vector<1x384xf32> to vector<1x1x384xf32>
      tpu.vector_store %arg5[%c0_21, %c0_22, %c0_23], %54 {strides = array<i32>} : memref<1x1x384xf32, #tpu.memory_space<vmem>>, vector<1x1x384xf32>,
    } else {
    }
    return
  }
  func.func @transform_0(%arg0: i32, %arg1: i32) -> (i32, i32) {
    %c0_i32 = arith.constant 0 : i32
    %c0_i32_0 = arith.constant 0 : i32
    %c0_i32_1 = arith.constant 0 : i32
    return %c0_i32, %c0_i32_0 : i32, i32
  }
  func.func @transform_1(%arg0: i32, %arg1: i32) -> (i32, i32, i32) {
    %c0_i32 = arith.constant 0 : i32
    %c0_i32_0 = arith.constant 0 : i32
    %c0_i32_1 = arith.constant 0 : i32
    return %arg0, %c0_i32, %c0_i32_0 : i32, i32, i32
  }
  func.func @transform_2(%arg0: i32, %arg1: i32) -> (i32, i32, i32) {
    %c0_i32 = arith.constant 0 : i32
    %c0_i32_0 = arith.constant 0 : i32
    return %arg0, %arg1, %c0_i32 : i32, i32, i32
  }
  func.func @transform_3(%arg0: i32, %arg1: i32) -> (i32, i32, i32) {
    %c0_i32 = arith.constant 0 : i32
    %c0_i32_0 = arith.constant 0 : i32
    %c0_i32_1 = arith.constant 0 : i32
    return %arg0, %c0_i32, %c0_i32_0 : i32, i32, i32
  }
}

</mosaic_0001>

<bundles_post_ra>
// kernel: tpu_custom_call.1
= control target key start
LH: loop header
LB: loop body
LE: loop exit
PB: predicated region body
PF: predicated region fallthrough
CT: control target
= control target key end

     0   :  { %8 = vsyncpa [#allocation4], 0  ;;  %s1347_s0 = inlined_call_operand.hbm [shape: f32[2,384], index: 0, kind: input, shape index: {}]   ;;  %s1348_s1 = inlined_call_operand.hbm [shape: f32[2,2,384], index: 1, kind: input, shape index: {}]   ;;  %s1349_s2 = inlined_call_operand.hbm [shape: f32[2,4,384], index: 2, kind: input, shape index: {}]   ;;  %s1350_s3 = inlined_call_operand.hbm [shape: f32[2,1,384], index: 3, kind: output, shape index: {}]  }
   0x1   :  { %9 = vsyncpa [#allocation7], 0 }
   0x2   :  { %11 = vsyncpa [#allocation7 + $0x1], 0 }
   0x3   :  { %12 = vsyncpa [#allocation5], 0 }
   0x4   :  { %14 = vsyncpa [#allocation5 + $0x1], 0  ;;  %s1010_s12 = smov 0   ;;  %s1012_s13 = smov 0  }
   0x5   :  { %s1014_s14 = smov 0   ;;  %s1016_s15 = smov 0  }
   0x6   :  { %s1018_s16 = smov 0   ;;  %s1020_s17 = smov 0  }
   0x7 LB: > { %s32_s18 = sadd.s32 1, %s974_s16  ;;  %s60_s19 = sadd.s32 1, %s966_s14  ;;  %s978_s17 = sphi %s1020_s17, %s20_s17   ;;  %s974_s16 = sphi %s1018_s16, %s1374_s16   ;;  %s970_s15 = sphi %s1016_s15, %s1373_s15   ;;  %s966_s14 = sphi %s1014_s14, %s1372_s14   ;;  %s962_s13 = sphi %s1012_s13, %s1371_s13   ;;  %s958_s12 = sphi %s1010_s12, %s1370_s12  }
   0x8   : > { %p34_p0 = scmp.ge.s32.totalorder %s32_s18, 2  ;;  %p67_p1 = scmp.ne.s32.totalorder %s966_s14, %s962_s13 }
   0x9   : > { %p68_p2 = scmp.eq.s32.totalorder %s978_s17, 0  ;;  %p736_p5 = scmp.lt.s32.totalorder %s978_s17, 2 }
   0xa   : > { %s1376_s18 = smov (%p34_p0, %s32_s18), 0  ;;  %s162_s21 = sand.u32 1, %s978_s17  }
   0xb   : > { %p69_p4 = por %p68_p2, %p67_p1  ;;  %s57_s20 = ssub.s32 %s974_s16, %s1376_s18 }
   0xc   : > { %p58_p6 = scmp.eq.s32.totalorder %s57_s20, 0  ;;  %s164_s22 = sand.u32 1, %s966_s14  }
   0xd   : > { %s699_s23 = smul.u32 96, %s974_s16  ;;  %p1065_p7 = pnand %p736_p5, %p69_p4 }
   0xe   : > { %s1058_s24 = scalar_select %p58_p6, %s966_s14, %s60_s19  }
   0xf   : > { %s698_s25 = smul.u32 6, %s164_s22  ;;  %s1063_s28 = scalar_lea.hbm %s1348_s1, %s699_s23 }
  0x10   : > { %s1069_s30 = smul.u32 12, %s164_s22  ;;  %s1073_s6 = scalar_lea.sflag [#allocation7], %s162_s21 }
  0x11   : > { %s166_s4 = scalar_lea.vmem [#allocation6], %s698_s25  ;;  %s804_s7 = scalar_lea.hbm %s1063_s28, 96 }
  0x12   : > { %s174_s5 = sshll.u32 %s166_s4, 4  ;;  %p805_p8 = scmp.ne.s32.totalorder %s1063_s28, %s804_s7  ;;  %s1071_s5 = int_to_ptr.vmem [resolvable:$true] %s174_s5 }
  0x13   : > { %p806_p9 = pneg %p1065_p7  ;;  %s809_s10 = scalar_lea.hbm %s1348_s1, 192 }
  0x14   : > { %p810_p12 = scmp.lt.u32.totalorder %s1063_s28, %s1348_s1  ;;  %p811_p13 = scmp.lt.u32.totalorder %s809_s10, %s804_s7 }
  0x15   : > { %p807_p10 = pnand %p806_p9, %p805_p8  ;;  %p813_p2 = scmp.lt.u32.totalorder %s804_s7, %s1063_s28 }
  0x16   : > { %p812_p0 = por %p811_p13, %p810_p12 }
  0x17   : > { %p808_p11 = pneg %p807_p10 }
  0x18   : > { %p814_p4 = por %p813_p2, %p812_p0 }
  0x1a   : > { %p815_p5 = pnand %p814_p4, %p808_p11 }
  0x1c   : > { %818 = shalt.err (!%p815_p5)
}
  0x1d   : > { %s819_s20 = scalar_lea.vmem %s1071_s5, 96  ;;  %s980_s21 = smov [#allocation6]  }
  0x1e   : > { %p820_p6 = scmp.ne.s32.totalorder %s1071_s5, %s819_s20  ;;  %s824_s22 = sshll.u32 %s980_s21, 4  ;;  %s825_s22 = int_to_ptr.vmem [resolvable:$false] %s824_s22 }
  0x1f   : > { %s826_s23 = scalar_lea.vmem %s825_s22, 192  ;;  %p827_p3 = scmp.lt.s32.totalorder %s1071_s5, %s825_s22 }
  0x20   : > { %p822_p8 = pnand %p820_p6, %p806_p9  ;;  %p828_p12 = scmp.lt.s32.totalorder %s826_s23, %s819_s20 }
  0x22   : > { %p823_p10 = pneg %p822_p8  ;;  %p829_p13 = por %p828_p12, %p827_p3 }
  0x24   : > { %p830_p0 = pnand %p829_p13, %p823_p10 }
  0x26   : > { %833 = shalt.err (!%p830_p0)
}
  0x27   : > { %727 = dma.hbm_to_vmem [thread:$0]  (!%p1065_p7), %s1063_s28, 96, %s1071_s5, %s1073_s6  }
  0x28   : > { %s1102_s25 = sadd.s32 4294967295, %s978_s17   ;;  %s685_s26 = sadd.s32 4294967294, %s978_s17  }
  0x29   : > { %p73_p3 = scmp.ne.s32.totalorder %s962_s13, %s958_s12  ;;  %p1351_p11 = scmp.eq.s32.totalorder %s1102_s25, 0 }
  0x2a   : > { %p125_p2 = scmp.eq.s32.totalorder %s1102_s25, 1  ;;  %p131_p4 = scmp.eq.s32.totalorder %s685_s26, 1 }
  0x2b   : > { %p1111_p5 = por %p1351_p11, %p73_p3  ;;  %p686_p6 = scmp.ge.s32.totalorder %s978_s17, 1 }
  0x2c   : > { %p1119_p8 = por %p125_p2, %p67_p1  ;;  %p1123_p10 = por %p131_p4, %p73_p3 }
  0x2d   : > { %s1356_s27 = scalar_select %p1111_p5, 1, 0 }
  0x2e   : > { %s1357_s28 = scalar_select %p1119_p8, 1, 0 }
  0x2f   : > { %s1358_s4 = scalar_select %p1123_p10, 1, 0 }
  0x30   : > { %p138_p12 = scmp.lt.s32.totalorder %s978_s17, 3  ;;  %s981_s7 = smov [#allocation3]  }
  0x31   : > { %s151_s8 = sshll.u32 %s981_s7, 4  ;;  %s701_s9 = smul.u32 192, %s974_s16  ;;  %s1143_s8 = int_to_ptr.vmem [resolvable:$true] %s151_s8 }
  0x32   : > { %p1128_p13 = pnand %p686_p6, %p138_p12  ;;  %s185_s10 = scalar_lea.vmem [#allocation8], %s1069_s30 }
  0x33   : > { %s195_s11 = sshll.u32 %s185_s10, 4  ;;  %s1139_s21 = scalar_lea.hbm %s1349_s2, %s701_s9  ;;  %s1141_s11 = int_to_ptr.vmem [resolvable:$true] %s195_s11 }
  0x34   : > { %s1359_s5 = scalar_select %p1128_p13, 1, 0 }
  0x35   : > { %p720_p0 = pneg %p1128_p13  ;;  %s834_s30 = scalar_lea.hbm %s1139_s21, 192 }
  0x36   : > { %p835_p3 = scmp.ne.s32.totalorder %s1139_s21, %s834_s30  ;;  %s839_s7 = scalar_lea.hbm %s1349_s2, 384 }
  0x37   : > { %p1147_p1 = pnand %p720_p0, %p1351_p11  ;;  %p840_p6 = scmp.lt.u32.totalorder %s1139_s21, %s1349_s2 }
  0x38   : > { %p837_p2 = pnand %p835_p3, %p806_p9  ;;  %p841_p12 = scmp.lt.u32.totalorder %s839_s7, %s834_s30 }
  0x39   : > { %p843_p0 = scmp.lt.u32.totalorder %s834_s30, %s1139_s21 }
  0x3a   : > { %p838_p4 = pneg %p837_p2  ;;  %p842_p10 = por %p841_p12, %p840_p6 }
  0x3c   : > { %p844_p11 = por %p843_p0, %p842_p10 }
  0x3e   : > { %p845_p8 = pnand %p844_p11, %p838_p4 }
  0x40   : > { %848 = shalt.err (!%p845_p8)
}
  0x41   : > { %s849_s19 = scalar_lea.vmem %s1141_s11, 192  ;;  %s982_s20 = smov [#allocation8]  }
  0x42   : > { %p850_p3 = scmp.ne.s32.totalorder %s1141_s11, %s849_s19  ;;  %s854_s23 = sshll.u32 %s982_s20, 4  ;;  %s855_s23 = int_to_ptr.vmem [resolvable:$false] %s854_s23 }
  0x43   : > { %s856_s26 = scalar_lea.vmem %s855_s23, 384  ;;  %p857_p13 = scmp.lt.s32.totalorder %s1141_s11, %s855_s23 }
  0x44   : > { %p852_p2 = pnand %p850_p3, %p806_p9  ;;  %p858_p6 = scmp.lt.s32.totalorder %s856_s26, %s849_s19 }
  0x46   : > { %p853_p5 = pneg %p852_p2  ;;  %p859_p12 = por %p858_p6, %p857_p13 }
  0x48   : > { %p860_p10 = pnand %p859_p12, %p853_p5 }
  0x4a   : > { %863 = shalt.err (!%p860_p10)
}
  0x4b   : > { %730 = dma.hbm_to_vmem [thread:$0]  (!%p1065_p7), %s1139_s21, 192, %s1141_s11, %s1073_s6  }
  0x4c   : > { %s864_s9 = scalar_lea.hbm %s1347_s0, 96  ;;  %p866_p11 = pneg %p1147_p1 }
  0x4d   : > { %p865_p9 = scmp.ne.s32.totalorder %s1347_s0, %s864_s9  ;;  %p871_p13 = scmp.lt.u32.totalorder %s864_s9, %s1347_s0 }
  0x4f   : > { %p867_p8 = pnand %p866_p11, %p865_p9 }
  0x51   : > { %p868_p5 = pneg %p867_p8 }
  0x53   : > { %p873_p4 = pnand %p871_p13, %p868_p5 }
  0x55   : > { %876 = shalt.err (!%p873_p4)
}
  0x56   : > { %s877_s29 = scalar_lea.vmem %s1143_s8, 96  ;;  %p885_p2 = scmp.lt.s32.totalorder %s1143_s8, %s1143_s8 }
  0x57   : > { %p878_p7 = scmp.ne.s32.totalorder %s1143_s8, %s877_s29  ;;  %p886_p6 = scmp.lt.s32.totalorder %s877_s29, %s877_s29 }
  0x59   : > { %p880_p0 = pnand %p878_p7, %p866_p11  ;;  %p887_p12 = por %p886_p6, %p885_p2 }
  0x5b   : > { %p881_p3 = pneg %p880_p0 }
  0x5d   : > { %p888_p10 = pnand %p887_p12, %p881_p3 }
  0x5f   : > { %891 = shalt.err (!%p888_p10)
}
  0x60   : > { %723 = dma.hbm_to_vmem [thread:$0]  (!%p1147_p1), %s1347_s0, 96, %s1143_s8, [#allocation4]  }
  0x61   : > { %p1361_p9 = scmp.ne.s32.totalorder %s1359_s5, 0 }
  0x62   : > { %p1362_p8 = scmp.eq.s32.totalorder (!%p1361_p9), %s1102_s25, 0 }
  0x63   : > { %204 = sbr.rel (%p1361_p9) target bundleno = 741 (0x2e5), region = 32 }
  0x6a   : > { %945 = dma.done.wait (%p1362_p8), [#allocation4], 96   ;;  %p1363_p11 = pmov %p1362_p8 }
  0x6b   : > { %s210_s21 = sand.u32 1, %s1102_s25   ;;  %s1204_s26 = sand.u32 1, %s962_s13  }
  0x6c   : > { %947 = vsyncadd (%p1363_p11), [#allocation4], 4294967200  ;;  %s702_s22 = smul.u32 6, %s1204_s26  ;;  %s211_s30 = scalar_lea.sflag [#allocation7], %s210_s21 }
  0x6d   : > { %p1364_p1 = scmp.ne.s32.totalorder %s1356_s27, 0 }
  0x6e   : > { %s214_s7 = scalar_lea.vmem [#allocation6], %s702_s22 }
  0x6f   : > { %949 = dma.done.wait (%p1364_p1), %s211_s30, 288  }
  0x70   : > { %951 = vsyncadd (%p1364_p1), %s211_s30, 4294967008  ;;  %v255_v0 = vlaneseq  ;;  %s703_s5 = smul.u32 12, %s1204_s26  ;;  %v983_v3 = vmov 0.0   ;;  %v1225_v7 = vld [vmem:[%s214_s7] sm:$0x3f]  ;;  %s984_s27 = smov 1  }
  0x71   : > { %s985_s8 = smov 127   ;;  %v303_v31 = vld [vmem:[#allocation3] sm:$0x3f]  ;;  %s986_s9 = smov 16   ;;  %vm451_vm5 = vcmask 1043456   ;;  %vm535_vm6 = vcmask 1040384  }
  0x72   : > { %vm1212_vm0 = vcmp.lt.s32.totalorder %v255_v0, 384  ;;  %v1216_v2 = vshrl.u32 %v255_v0, 7  ;;  %s223_s25 = scalar_lea.vmem [#allocation8], %s703_s5  ;;  %v1255_v32 = vand.u32 127, %v255_v0  ;;  %s987_s10 = smov 112  }
  0x73   : > { %259 = vst.msk [vmem:[#allocation2] sm:$0x7] %vm1212_vm0, %v983_v3  ;;  %v1227_v8 = vld [vmem:[%s223_s25 + $0x8] sm:$0xf]  ;;  %v1229_v9 = vld [vmem:[%s223_s25] sm:$0xff]  ;;  %s704_s19 = smul.u32 3, %s1204_s26 }
  0x74   : > { %v1221_v4 = vsub.s32 1, %v1216_v2  ;;  %v276_v5 = vsub.s32 5, %v1216_v2  ;;  %v272_v6 = vsub.s32 3, %v1216_v2  ;;  %v264_v10 = vmax.f32 %v1227_v8, 0.0  ;;  %s709_s23 = smul.u32 48, %s970_s15  ;;  %s557_s7 = scalar_lea.sflag [#allocation5], %s1204_s26 }
  0x75   : > { %v263_v16 = vmax.f32 %v1229_v9, 0.0  ;;  %v1251_v28 = vsub.s32 0, %v1216_v2  ;;  %v328_v29 = vsub.s32 2, %v1216_v2  ;;  %v332_v30 = vsub.s32 4, %v1216_v2  ;;  %s250_s29 = scalar_lea.vmem [#allocation9], %s704_s19  ;;  %p1367_p13 = scmp.ne.s32.totalorder %s1357_s28, 0 }
  0x76   : > { %v277_v11 = vrot.slane %v1225_v7, %v276_v5  ;;  %v269_v12 = vrot.slane %v1225_v7, %v1221_v4  ;;  %v273_v13 = vrot.slane %v1225_v7, %v272_v6  ;;  %v379_v37 = vrot.slane %v303_v31, %v276_v5  ;;  %s571_s6 = sshll.u32 %s250_s29, 4  ;;  %s1296_s30 = scalar_lea.hbm %s1350_s3, %s709_s23  ;;  %s1298_s6 = int_to_ptr.vmem [resolvable:$true] %s571_s6 }
  0x77   : > { %v325_v34 = vrot.slane %v303_v31, %v1251_v28  ;;  %v329_v35 = vrot.slane %v303_v31, %v328_v29  ;;  %v333_v36 = vrot.slane %v303_v31, %v332_v30  ;;  %vm317_vm1 = vcmp.lt.s32.totalorder %v1255_v32, 1  ;;  %s892_s15 = scalar_lea.vmem %s1298_s6, 48  ;;  %s989_s5 = smov [#allocation9]  }
  0x78   : > { %v292_v14 = vrot.slane %v277_v11, %v1221_v4  ;;  %v284_v15 = vrot.slane %v269_v12, %v1221_v4  ;;  %v288_v17 = vrot.slane %v273_v13, %v1221_v4  ;;  %v371_v40 = vrot.slane %v303_v31, %v1221_v4  ;;  %p893_p5 = scmp.ne.s32.totalorder %s1298_s6, %s892_s15  ;;  %s896_s25 = sshll.u32 %s989_s5, 4  ;;  %s897_s25 = int_to_ptr.vmem [resolvable:$false] %s896_s25 }
  0x79   : > { %v375_v41 = vrot.slane %v303_v31, %v272_v6  ;;  %v340_v42 = vrot.slane %v325_v34, %v1251_v28  ;;  %v344_v43 = vrot.slane %v329_v35, %v1251_v28  ;;  %v348_v44 = vrot.slane %v333_v36, %v1251_v28  ;;  %p899_p0 = scmp.lt.s32.totalorder %s1298_s6, %s897_s25 }
  0x7a   : > { %v298_v18 = vmul.f32 %v292_v14, %v264_v10  ;;  %v295_v19 = vcombine.low %v284_v15, %v288_v17  ;;  %vm364_vm2 = vcmp.lt.s32.totalorder %v1255_v32, 127  ;;  %v394_v46 = vrot.slane %v379_v37, %v1221_v4  ;;  %p894_p4 = pnand %p893_p5, %p1367_p13 }
  0x7b   : > { %v386_v51 = vrot.slane %v371_v40, %v1221_v4  ;;  %v390_v52 = vrot.slane %v375_v41, %v1221_v4  ;;  %vm413_vm3 = vcmp.lt.s32.totalorder %v1255_v32, 16  ;;  %vm429_vm4 = vcmp.lt.s32.totalorder %v1255_v32, 112 }
  0x7c   : > { %v301_v20 = vmul.f32 1.442695, %v298_v18  ;;  %v297_v21 = vmul.f32 %v295_v19, %v263_v16  ;;  %p895_p7 = pneg %p894_p4 }
  0x7e   : > { %794 = vpow2.f32 %v301_v20  ;;  %v299_v22 = vmul.f32 1.442695, %v297_v21 }
  0x80   : > { %796 = vpow2.f32 %v299_v22 }
  0x88   : > { %v1244_v23 = vpop.eup %794 }
  0x89   : > { %v694_v24 = vadd.f32 -1.0, %v1244_v23 }
  0x8a   : > { %v1247_v25 = vpop.eup %796 }
  0x8b   : > { %313 = vrot.lane.b32.xlu1 %v694_v24, %s984_s27  ;;  %v693_v26 = vadd.f32 -1.0, %v1247_v25 }
  0x8d   : > { %309 = vrot.lane.b32.xlu0 %v693_v26, %s984_s27  ;;  %v307_v27 = vcombine.high %v693_v26, %v693_v26 }
  0x8f   : > { %358 = vrot.lane.b32.xlu1 %v693_v26, %s985_s8 }
  0x91   : > { %311 = vrot.lane.b32.xlu0 %v307_v27, %s984_s27  ;;  %s898_s27 = scalar_lea.vmem %s897_s25, 96 }
  0x92   : > { %p900_p3 = scmp.lt.s32.totalorder %s898_s27, %s892_s15 }
  0x93   : > { %362 = vrot.lane.b32.xlu1 %v694_v24, %s985_s8 }
  0x94   : > { %p901_p2 = por %p900_p3, %p899_p0 }
  0x95   : > { %360 = vrot.lane.b32.xlu0 %v307_v27, %s985_s8 }
  0x96   : > { %p902_p6 = pnand %p901_p2, %p895_p7 }
  0xfd   : > { %v314_v33 = vpop.permute.xlu1 %313 }
  0xff   : > { %v310_v38 = vpop.permute.xlu0 %309 }
 0x100   : > { %v320_v45 = vsel %vm317_vm1, %v314_v33, %v310_v38 }
 0x101   : > { %v359_v39 = vpop.permute.xlu1 %358  ;;  %v349_v53 = vmul.f32 %v340_v42, %v320_v45 }
 0x103   : > { %v312_v47 = vpop.permute.xlu0 %311 }
 0x104   : > { %v318_v48 = vsel %vm317_vm1, %v312_v47, %v314_v33  ;;  %v319_v49 = vsel %vm317_vm1, %v310_v38, %v312_v47 }
 0x105   : > { %v363_v50 = vpop.permute.xlu1 %362  ;;  %v350_v54 = vmul.f32 %v344_v43, %v319_v49  ;;  %v351_v55 = vmul.f32 %v348_v44, %v318_v48 }
 0x106   : > { %v367_v56 = vsel %vm364_vm2, %v363_v50, %v359_v39 }
 0x107   : > { %v397_v57 = vmul.f32 %v394_v46, %v367_v56  ;;  %v354_v58 = vcombine.low %v349_v53, %v350_v54  ;;  %v357_v59 = vadd.f32 %v694_v24, %v351_v55  ;;  %v361_v60 = vpop.permute.xlu0 %360 }
 0x108   : > { %v365_v61 = vsel %vm364_vm2, %v361_v60, %v363_v50  ;;  %v366_v62 = vsel %vm364_vm2, %v359_v39, %v361_v60 }
 0x109   : > { %v395_v63 = vmul.f32 %v386_v51, %v366_v62  ;;  %v396_v0 = vmul.f32 %v390_v52, %v365_v61  ;;  %v403_v3 = vadd.f32 %v397_v57, %v357_v59  ;;  %v356_v5 = vadd.f32 %v693_v26, %v354_v58 }
 0x10b   : > { %v400_v6 = vcombine.low %v395_v63, %v396_v0  ;;  %411 = vrot.lane.b32.xlu0 %v403_v3, %s986_s9 }
 0x10d   : > { %v402_v11 = vadd.f32 %v400_v6, %v356_v5 }
 0x10f   : > { %423 = vrot.lane.b32.xlu1 %v402_v11, %s987_s10  ;;  %407 = vrot.lane.b32.xlu0 %v402_v11, %s986_s9  ;;  %v405_v12 = vcombine.high %v402_v11, %v402_v11 }
 0x113   : > { %425 = vrot.lane.b32.xlu0 %v405_v12, %s987_s10  ;;  %409 = vrot.lane.b32.xlu1 %v405_v12, %s986_s9 }
 0x117   : > { %427 = vrot.lane.b32.xlu1 %v403_v3, %s987_s10 }
 0x17d   : > { %v412_v13 = vpop.permute.xlu0 %411 }
 0x181   : > { %v424_v14 = vpop.permute.xlu1 %423  ;;  %v408_v15 = vpop.permute.xlu0 %407 }
 0x182   : > { %v416_v18 = vsel %vm413_vm3, %v412_v13, %v408_v15 }
 0x185   : > { %v410_v17 = vpop.permute.xlu1 %409  ;;  %v426_v22 = vpop.permute.xlu0 %425 }
 0x186   : > { %v414_v19 = vsel %vm413_vm3, %v410_v17, %v412_v13  ;;  %v415_v20 = vsel %vm413_vm3, %v408_v15, %v410_v17  ;;  %v431_v27 = vsel %vm429_vm4, %v424_v14, %v426_v22 }
 0x187   : > { %v419_v21 = vcombine.low %v416_v18, %v415_v20  ;;  %v422_v24 = vadd.f32 %v414_v19, %v403_v3 }
 0x189   : > { %v428_v26 = vpop.permute.xlu1 %427  ;;  %v421_v33 = vadd.f32 %v419_v21, %v402_v11  ;;  %v447_v11 = vld [vmem:[#allocation2] sm:$0x7] }
 0x18a   : > { %v430_v30 = vsel %vm429_vm4, %v426_v22, %v428_v26  ;;  %v432_v31 = vsel %vm429_vm4, %v428_v26, %v424_v14 }
 0x18b   : > { %v435_v34 = vcombine.low %v431_v27, %v430_v30  ;;  %v438_v35 = vadd.f32 %v432_v31, %v422_v24 }
 0x18d   : > { %v437_v36 = vadd.f32 %v435_v34, %v421_v33  ;;  %v440_v37 = vadd.f32 9.0, %v438_v35 }
 0x18f   : > { %v439_v38 = vadd.f32 9.0, %v437_v36  ;;  %798 = vrcp.f32 %v440_v37 }
 0x191   : > { %800 = vrcp.f32 %v439_v38 }
 0x199   : > { %v799_v39 = vpop.eup %798 }
 0x19a   : > { %v444_v40 = vmul.f32 %v799_v39, %v1244_v23 }
 0x19b   : > { %v801_v41 = vpop.eup %800 }
 0x19c   : > { %v442_v32 = vmul.f32 %v801_v41, %v1247_v25  ;;  %v446_v42 = vmul.f32 %v444_v40, %v264_v10  ;;  %v988_v25 = vmov 1966171168  }
 0x19d   : > { %v478_v56 = vunpack.c.l.s4 %v988_v25 }
 0x19e   : > { %v445_v43 = vmul.f32 %v442_v32, %v263_v16  ;;  %v466_v44 = vsel %vm451_vm5, %v446_v42, -inf }
 0x19f   : > { %v467_v45 = vrot.slane %v466_v44, 4  ;;  %v479_v58 = vunpack.c.0.s8 %v478_v56 }
 0x1a0   : > { %v449_v46 = vcombine.high %v445_v43, %v445_v43  ;;  %v452_v47 = vsel %vm451_vm5, %v445_v43, -inf }
 0x1a1   : > { %v453_v48 = vrot.slane %v452_v47, 4  ;;  %v468_v49 = vmax.f32 %v466_v44, %v467_v45  ;;  %v482_v63 = vsub.s32 %v479_v58, %v1216_v2 }
 0x1a2   : > { %v459_v50 = vsel %vm451_vm5, %v449_v46, -inf }
 0x1a3   : > { %v454_v51 = vmax.f32 %v452_v47, %v453_v48  ;;  %v460_v52 = vrot.slane %v459_v50, 4  ;;  %v469_v23 = vrot.slane %v468_v49, 2  ;;  %v516_v14 = vrot.slane %v1225_v7, %v482_v63 }
 0x1a5   : > { %v455_v53 = vrot.slane %v454_v51, 2  ;;  %v461_v54 = vmax.f32 %v459_v50, %v460_v52  ;;  %v470_v55 = vmax.f32 %v468_v49, %v469_v23 }
 0x1a7   : > { %v456_v8 = vmax.f32 %v454_v51, %v455_v53  ;;  %v462_v10 = vrot.slane %v461_v54, 2  ;;  %v471_v16 = vrot.slane %v470_v55, 1 }
 0x1a9   : > { %v457_v57 = vrot.slane %v456_v8, 1  ;;  %v463_v9 = vmax.f32 %v461_v54, %v462_v10  ;;  %v472_v62 = vmax.f32 %v470_v55, %v471_v16 }
 0x1ab   : > { %v464_v59 = vrot.slane %v463_v9, 1  ;;  %v458_v60 = vmax.f32 %v456_v8, %v457_v57  ;;  %v490_v5 = vrot.slane %v472_v62, %v482_v63 }
 0x1ad   : > { %v465_v61 = vmax.f32 %v463_v9, %v464_v59 }
 0x1af   : > { %v476_v0 = vcombine.low %v458_v60, %v465_v61 }
 0x1b1   : > { %v483_v3 = vrot.slane %v476_v0, %v482_v63 }
 0x1b3   : > { %v491_v6 = vcombine.low %v483_v3, %v490_v5 }
 0x1b5   : > { %v498_v12 = vrot.slane %v491_v6, %v482_v63 }
 0x1b7   : > { %v500_v13 = vmax.f32 %v447_v11, %v498_v12 }
 0x1b9   : > { %505 = vst.msk [vmem:[#allocation2] sm:$0x7] %vm1212_vm0, %v500_v13 }
 0x1c0   : > { %v509_v15 = vld [vmem:[#allocation2] sm:$0x7] }
 0x1c1   : > { %v518_v17 = vmul.f32 %v516_v14, %v509_v15 }
 0x1c3   : > { %v523_v18 = vrot.slane %v518_v17, %v1251_v28  ;;  %v527_v19 = vrot.slane %v518_v17, %v1221_v4  ;;  %v531_v20 = vrot.slane %v518_v17, %v328_v29 }
 0x1c5   : > { %v536_v21 = vsel %vm535_vm6, %v523_v18, 0.0  ;;  %v537_v22 = vsel %vm535_vm6, %v527_v19, 0.0  ;;  %v539_v26 = vsel %vm535_vm6, %v531_v20, 0.0 }
 0x1c6   : > { %v538_v24 = vadd.f32 %v537_v22, %v536_v21 }
 0x1c8   : > { %v540_v27 = vadd.f32 %v539_v26, %v538_v24 }
 0x1ca   : > { %541 = vadd.xlane.f32.xlu0 %v540_v27 }
 0x257   : > { %v542_v30 = vpop.xlane.xlu0 %541 }
 0x258   : > { %v543_v7 = vrot.slane %v542_v30, 4 }
 0x25a   : > { %v544_v31 = vadd.f32 %v543_v7, %v542_v30 }
 0x25c   : > { %v545_v33 = vrot.slane %v544_v31, 2 }
 0x25e   : > { %v546_v34 = vadd.f32 %v545_v33, %v544_v31 }
 0x260   : > { %v547_v35 = vrot.slane %v546_v34, 1 }
 0x262   : > { %v548_v28 = vadd.f32 %v547_v35, %v546_v34 }
 0x264   : > { %705 = vpush %v548_v28 }
 0x295   : > { %s706_s20 = spop %705 }
 0x296   : > { %v550_v2 = vstv %s706_s20 }
 0x297   : > { %802 = vrcp.f32 %v550_v2 }
 0x2a1   : > { %v803_v4 = vpop.eup %802 }
 0x2a2   : > { %707 = vpush %v803_v4 }
 0x2d3   : > { %s708_s11 = spop %707 }
 0x2d4   : > { %v553_v29 = vstv %s708_s11 }
 0x2d5   : > { %v554_v36 = vmul.f32 %v553_v29, %v518_v17 }
 0x2d7   : > { %555 = vst.msk [vmem:[%s250_s29] sm:$0x7] %vm1212_vm0, %v554_v36 }
 0x2d8   : > { %905 = shalt.err (!%p902_p6)
}
 0x2d9   : > { %s906_s26 = scalar_lea.hbm %s1296_s30, 48  ;;  %s910_s10 = scalar_lea.hbm %s1350_s3, 96 }
 0x2da   : > { %p907_p12 = scmp.ne.s32.totalorder %s1296_s30, %s906_s26  ;;  %p911_p8 = scmp.lt.u32.totalorder %s1296_s30, %s1350_s3 }
 0x2db   : > { %p912_p11 = scmp.lt.u32.totalorder %s910_s10, %s906_s26  ;;  %p914_p5 = scmp.lt.u32.totalorder %s906_s26, %s1296_s30 }
 0x2dc   : > { %p908_p10 = pnand %p907_p12, %p1367_p13 }
 0x2dd   : > { %p913_p1 = por %p912_p11, %p911_p8 }
 0x2de   : > { %p909_p9 = pneg %p908_p10 }
 0x2df   : > { %p915_p4 = por %p914_p5, %p913_p1 }
 0x2e1   : > { %p916_p7 = pnand %p915_p4, %p909_p9 }
 0x2e3   : > { %919 = shalt.err (!%p916_p7)
}
 0x2e4   : > { %718 = dma.vmem_to_hbm [thread:$0]  (%p1367_p13), %s1298_s6, 48, %s1296_s30, %s557_s7  }
 0x2e5 PF: > { %s583_s23 = sand.u32 1, %s958_s12   ;;  %p1368_p0 = scmp.ne.s32.totalorder %s1358_s4, 0 }
 0x2e6   : > { %p1369_p3 = scmp.ge.s32.totalorder %s978_s17, 2  ;;  %s584_s29 = scalar_lea.sflag [#allocation5], %s583_s23 }
 0x2e8   : > { %p732_p2 = pnand %p1369_p3, %p1368_p0 }
 0x2ea   : > { %953 = dma.done.wait (!%p732_p2), %s584_s29, 48  }
 0x2eb   : > { %955 = vsyncadd (!%p732_p2), %s584_s29, 4294967248  ;;  %s20_s17 = sadd.s32 1, %s978_s17   ;;  %s1370_s12 = smov %s962_s13 }
 0x2ec   : > { %p17_p6 = scmp.ge.s32.totalorder %s20_s17, 4   ;;  %s1371_s13 = smov %s966_s14 }
 0x2ed   : > { %s1372_s14 = smov %s1058_s24  ;;  %s1373_s15 = smov %s974_s16 }
 0x2ee   : > { %s1374_s16 = smov %s1376_s18  ;;  %19 = sbr.rel (!%p17_p6) target bundleno = 7 (0x7), region = 101 }
 0x2f5   :  { %589 = vsyncpa [#allocation4], 1 }
 0x2f6   :  { %591 = vsyncpa [#allocation4 + $0x1], 1 }
 0x2f7   :  { %592 = vsyncpa [#allocation7], 1 }
 0x2f8   :  { %594 = vsyncpa [#allocation7 + $0x1], 1 }
 0x2f9   :  { %595 = vsyncpa [#allocation5], 1 }
 0x2fa   :  { %597 = vsyncpa [#allocation5 + $0x1], 1 }

</bundles_post_ra>
